<compile_context>
chip_gen: v7x
topology: tpu7x:2x2x1
jax: 0.10.0
libtpu: 0.0.40
codegen_flags: <defaults>
</compile_context>

<pallas_src>
import math

import jax
import jax.numpy as jnp
from jax.experimental import pallas as pl
from jax.experimental.pallas import tpu as pltpu

NETWORK_CHANNELS = 64
NUM_HIDDEN_LAYERS = 4
OUT_CHANNELS = 1
LEAKY_SLOPE = 0.2  # matches the experiment's LinearOutputStack activation
MAX_BATCH_TILE = 4096


def _leaky_relu(y):
    # max(y, 0.2*y): mul+max on the VPU instead of mul+cmp+select.
    return jnp.maximum(y, LEAKY_SLOPE * y)


def _round_up(n, m):
    return ((n + m - 1) // m) * m


def discriminator_kernel(x_ref, wh_ref, bh_ref, wo_ref, bo_ref, o_ref):
    # x_ref : (TB, 64)     f32/bf16 - one batch tile (ragged tail padded by Pallas)
    # wh_ref: (4, 64, 64)  bf16     - hidden weights, stored (out, in), VMEM-resident
    # bh_ref: (4, 64, 1)   f32      - hidden biases (per out-channel, on sublanes)
    # wo_ref: (64, 1)      f32      - final 64->1 projection
    # bo_ref: (1, 1)       f32
    # o_ref : (1, 1, TB)   f32      - lane-dense output slab for this tile
    xb = x_ref[...].astype(jnp.bfloat16)                               # (TB, 64)
    # Layer 0: h^T = W0^T @ x^T  (transpose fused into the dot's RHS operand).
    y = jnp.dot(wh_ref[0], xb.T, preferred_element_type=jnp.float32)   # (64, TB)
    h = _leaky_relu(y + bh_ref[0])                                     # f32 elementwise
    for layer in range(1, NUM_HIDDEN_LAYERS):                          # static unroll
        y = jnp.dot(wh_ref[layer], h.astype(jnp.bfloat16),
                    preferred_element_type=jnp.float32)                # (64, TB)
        h = _leaky_relu(y + bh_ref[layer])
    # Final 64 -> 1 projection on VPU (mul) + XLU (sublane reduce); a 1-wide
    # matmul would waste nearly all MXU lanes. Result is already lane-dense.
    out = jnp.sum(h * wo_ref[...], axis=0, keepdims=True) + bo_ref[...]  # (1, TB)
    o_ref[0] = out.astype(o_ref.dtype)


def discriminator_forward(x, params, *, max_tile=MAX_BATCH_TILE):
    """x: (B, 64) float32 (or bfloat16) -> (B, 1) float32."""
    B, C = x.shape
    assert C == NETWORK_CHANNELS, C

    hidden = params[:NUM_HIDDEN_LAYERS]
    wo, bo = params[NUM_HIDDEN_LAYERS]

    # Pack parameters for the transposed (channels, batch) kernel layout.
    wh_t = jnp.stack([w.T for (w, _) in hidden]).astype(jnp.bfloat16)            # (4,64,64)
    bh_c = jnp.stack([b.reshape(C, 1) for (_, b) in hidden]).astype(jnp.float32)  # (4,64,1)
    wo_c = wo.reshape(C, OUT_CHANNELS).astype(jnp.float32)                        # (64,1)
    bo_s = bo.reshape(1, 1).astype(jnp.float32)                                   # (1,1)

    # Batch tiling: multiple of 8 sublanes; aim for >=2 grid steps (v7x dual-TC
    # sharding of the "parallel" axis); no wrapper-side pad -- Pallas handles
    # the ragged last block and we slice the output afterwards.
    tb = min(max_tile, _round_up(max(pl.cdiv(B, 2), 8), 8))
    num_tiles = pl.cdiv(B, tb)

    flops = num_tiles * tb * (NUM_HIDDEN_LAYERS * 2 * C * C + 2 * C)
    bytes_accessed = (num_tiles * tb * C * x.dtype.itemsize
                      + num_tiles * tb * 4
                      + NUM_HIDDEN_LAYERS * C * C * 2
                      + NUM_HIDDEN_LAYERS * C * 4 + C * 4 + 4)

    out = pl.pallas_call(
        discriminator_kernel,
        out_shape=jax.ShapeDtypeStruct((num_tiles, 1, tb), jnp.float32),
        grid=(num_tiles,),
        in_specs=[
            pl.BlockSpec((tb, C), lambda i: (i, 0)),          # x tile (pipelined)
            pl.BlockSpec(wh_t.shape, lambda i: (0, 0, 0)),    # VMEM-resident weights
            pl.BlockSpec(bh_c.shape, lambda i: (0, 0, 0)),    # VMEM-resident biases
            pl.BlockSpec(wo_c.shape, lambda i: (0, 0)),       # final proj column
            pl.BlockSpec(bo_s.shape, lambda i: (0, 0)),       # final proj bias
        ],
        out_specs=pl.BlockSpec((1, 1, tb), lambda i: (i, 0, 0)),  # lane-dense slab
        compiler_params=pltpu.CompilerParams(
            dimension_semantics=("parallel",)),
        cost_estimate=pl.CostEstimate(
            flops=flops, transcendentals=0, bytes_accessed=bytes_accessed),
    )(x, wh_t, bh_c, wo_c, bo_s)

    # (num_tiles, 1, tb) -> (B, 1); the reshape/slice only touches B*4 bytes.
    return out.reshape(num_tiles * tb)[:B].reshape(B, OUT_CHANNELS)


def init_params(key):
    """Deterministic init mimicking PyTorch nn.Linear defaults
    (uniform(-1/sqrt(fan_in), 1/sqrt(fan_in)) for both weight and bias)."""
    params = []
    dims = [(NETWORK_CHANNELS, NETWORK_CHANNELS)] * NUM_HIDDEN_LAYERS + \
           [(NETWORK_CHANNELS, OUT_CHANNELS)]
    for (fan_in, fan_out) in dims:
        key, kw, kb = jax.random.split(key, 3)
        bound = 1.0 / math.sqrt(fan_in)
        # store weight as (in, out) so the reference computes x @ W directly
        w = jax.random.uniform(kw, (fan_in, fan_out), jnp.float32, -bound, bound)
        b = jax.random.uniform(kb, (1, fan_out), jnp.float32, -bound, bound)
        params.append((w, b))
    return params


def reference_forward(x, params):
    """Pure-JAX f32 reference for sanity check."""
    h = x
    for i, (w, b) in enumerate(params):
        h = h @ w + b
        if i < len(params) - 1:
            h = _leaky_relu(h)
    return h


if __name__ == "__main__":
    key = jax.random.PRNGKey(0)
    key, kx = jax.random.split(key)
    params = init_params(key)

    # B=8: single-tile path.  B=20: >=2 grid steps + ragged last block
    # (exercises Pallas' OOB-read padding / output slicing without jnp.pad).
    for B in (8, 20):
        x = jax.random.normal(jax.random.fold_in(kx, B),
                              (B, NETWORK_CHANNELS), jnp.float32)
        out = jax.block_until_ready(discriminator_forward(x, params))
        ref = reference_forward(x, params)
        assert out.shape == (B, OUT_CHANNELS), out.shape
        # bf16 matmul operands with f32 accumulation -> loosened tolerance.
        assert jnp.allclose(out, ref, atol=5e-2, rtol=5e-2), (B, out, ref)

    print("KERNEL_OK")
</pallas_src>

<mosaic_0001>
module attributes {stable_mosaic.version = 11 : i64} {
  func.func @discriminator_kernel(%arg0: i32, %arg1: memref<8x64xf32, #tpu.memory_space<vmem>>, %arg2: memref<4x64x64xbf16, #tpu.memory_space<vmem>>, %arg3: memref<4x64x1xf32, #tpu.memory_space<vmem>>, %arg4: memref<64x1xf32, #tpu.memory_space<vmem>>, %arg5: memref<1x1xf32, #tpu.memory_space<vmem>>, %arg6: memref<1x1x8xf32, #tpu.memory_space<vmem>>) attributes {dimension_semantics = [#tpu.dimension_semantics<parallel>], iteration_bounds = array<i64: 1>, scalar_prefetch = 0 : i64, scratch_operands = 0 : i64, tpu.core_type = #tpu.core_type<tc>, window_params = [{transform_indices = @transform_0, window_bounds = array<i64: 8, 64>}, {pipeline_mode = #tpu.pipeline_mode<synchronous>, transform_indices = @transform_1, window_bounds = array<i64: 4, 64, 64>}, {pipeline_mode = #tpu.pipeline_mode<synchronous>, transform_indices = @transform_2, window_bounds = array<i64: 4, 64, 1>}, {pipeline_mode = #tpu.pipeline_mode<synchronous>, transform_indices = @transform_3, window_bounds = array<i64: 64, 1>}, {pipeline_mode = #tpu.pipeline_mode<synchronous>, transform_indices = @transform_4, window_bounds = array<i64: 1, 1>}, {transform_indices = @transform_5, window_bounds = array<i64: 1, 1, 8>}]} {
    %c0 = arith.constant 0 : index
    %c0_0 = arith.constant 0 : index
    %0 = vector.load %arg1[%c0, %c0_0] : memref<8x64xf32, #tpu.memory_space<vmem>>, vector<8x64xf32>
    %1 = arith.truncf %0 : vector<8x64xf32> to vector<8x64xbf16>
    %c0_1 = arith.constant 0 : index
    %c0_2 = arith.constant 0 : index
    %c0_3 = arith.constant 0 : index
    %2 = vector.load %arg2[%c0_1, %c0_2, %c0_3] : memref<4x64x64xbf16, #tpu.memory_space<vmem>>, vector<1x64x64xbf16>
    %3 = vector.shape_cast %2 : vector<1x64x64xbf16> to vector<64x64xbf16>
    %4 = tpu.transpose %1, [1, 0] : vector<8x64xbf16> -> vector<64x8xbf16>
    %cst = arith.constant dense<0.000000e+00> : vector<64x8xf32>
    %5 = tpu.matmul %3, %4, %cst {dimension_numbers = #tpu.dot_dimension_numbers<[1], [0], [0], [1], [0, 0, 1, 1], [], []>} : vector<64x64xbf16>, vector<64x8xbf16>, vector<64x8xf32> -> vector<64x8xf32>
    %c0_4 = arith.constant 0 : index
    %c0_5 = arith.constant 0 : index
    %c0_6 = arith.constant 0 : index
    %6 = vector.load %arg3[%c0_4, %c0_5, %c0_6] : memref<4x64x1xf32, #tpu.memory_space<vmem>>, vector<1x64x1xf32>
    %7 = vector.shape_cast %6 : vector<1x64x1xf32> to vector<64x1xf32>
    %8 = vector.broadcast %7 : vector<64x1xf32> to vector<64x8xf32>
    %9 = arith.addf %5, %8 : vector<64x8xf32>
    %cst_7 = arith.constant 2.000000e-01 : f32
    %10 = vector.broadcast %cst_7 : f32 to vector<64x8xf32>
    %11 = arith.mulf %10, %9 : vector<64x8xf32>
    %12 = arith.maximumf %9, %11 : vector<64x8xf32>
    %c1 = arith.constant 1 : index
    %c0_8 = arith.constant 0 : index
    %c0_9 = arith.constant 0 : index
    %13 = vector.load %arg2[%c1, %c0_8, %c0_9] : memref<4x64x64xbf16, #tpu.memory_space<vmem>>, vector<1x64x64xbf16>
    %14 = vector.shape_cast %13 : vector<1x64x64xbf16> to vector<64x64xbf16>
    %15 = arith.truncf %12 : vector<64x8xf32> to vector<64x8xbf16>
    %cst_10 = arith.constant dense<0.000000e+00> : vector<64x8xf32>
    %16 = tpu.matmul %14, %15, %cst_10 {dimension_numbers = #tpu.dot_dimension_numbers<[1], [0], [0], [1], [0, 0, 1, 1], [], []>} : vector<64x64xbf16>, vector<64x8xbf16>, vector<64x8xf32> -> vector<64x8xf32>
    %c1_11 = arith.constant 1 : index
    %c0_12 = arith.constant 0 : index
    %c0_13 = arith.constant 0 : index
    %17 = vector.load %arg3[%c1_11, %c0_12, %c0_13] : memref<4x64x1xf32, #tpu.memory_space<vmem>>, vector<1x64x1xf32>
    %18 = vector.shape_cast %17 : vector<1x64x1xf32> to vector<64x1xf32>
    %19 = vector.broadcast %18 : vector<64x1xf32> to vector<64x8xf32>
    %20 = arith.addf %16, %19 : vector<64x8xf32>
    %cst_14 = arith.constant 2.000000e-01 : f32
    %21 = vector.broadcast %cst_14 : f32 to vector<64x8xf32>
    %22 = arith.mulf %21, %20 : vector<64x8xf32>
    %23 = arith.maximumf %20, %22 : vector<64x8xf32>
    %c2 = arith.constant 2 : index
    %c0_15 = arith.constant 0 : index
    %c0_16 = arith.constant 0 : index
    %24 = vector.load %arg2[%c2, %c0_15, %c0_16] : memref<4x64x64xbf16, #tpu.memory_space<vmem>>, vector<1x64x64xbf16>
    %25 = vector.shape_cast %24 : vector<1x64x64xbf16> to vector<64x64xbf16>
    %26 = arith.truncf %23 : vector<64x8xf32> to vector<64x8xbf16>
    %cst_17 = arith.constant dense<0.000000e+00> : vector<64x8xf32>
    %27 = tpu.matmul %25, %26, %cst_17 {dimension_numbers = #tpu.dot_dimension_numbers<[1], [0], [0], [1], [0, 0, 1, 1], [], []>} : vector<64x64xbf16>, vector<64x8xbf16>, vector<64x8xf32> -> vector<64x8xf32>
    %c2_18 = arith.constant 2 : index
    %c0_19 = arith.constant 0 : index
    %c0_20 = arith.constant 0 : index
    %28 = vector.load %arg3[%c2_18, %c0_19, %c0_20] : memref<4x64x1xf32, #tpu.memory_space<vmem>>, vector<1x64x1xf32>
    %29 = vector.shape_cast %28 : vector<1x64x1xf32> to vector<64x1xf32>
    %30 = vector.broadcast %29 : vector<64x1xf32> to vector<64x8xf32>
    %31 = arith.addf %27, %30 : vector<64x8xf32>
    %cst_21 = arith.constant 2.000000e-01 : f32
    %32 = vector.broadcast %cst_21 : f32 to vector<64x8xf32>
    %33 = arith.mulf %32, %31 : vector<64x8xf32>
    %34 = arith.maximumf %31, %33 : vector<64x8xf32>
    %c3 = arith.constant 3 : index
    %c0_22 = arith.constant 0 : index
    %c0_23 = arith.constant 0 : index
    %35 = vector.load %arg2[%c3, %c0_22, %c0_23] : memref<4x64x64xbf16, #tpu.memory_space<vmem>>, vector<1x64x64xbf16>
    %36 = vector.shape_cast %35 : vector<1x64x64xbf16> to vector<64x64xbf16>
    %37 = arith.truncf %34 : vector<64x8xf32> to vector<64x8xbf16>
    %cst_24 = arith.constant dense<0.000000e+00> : vector<64x8xf32>
    %38 = tpu.matmul %36, %37, %cst_24 {dimension_numbers = #tpu.dot_dimension_numbers<[1], [0], [0], [1], [0, 0, 1, 1], [], []>} : vector<64x64xbf16>, vector<64x8xbf16>, vector<64x8xf32> -> vector<64x8xf32>
    %c3_25 = arith.constant 3 : index
    %c0_26 = arith.constant 0 : index
    %c0_27 = arith.constant 0 : index
    %39 = vector.load %arg3[%c3_25, %c0_26, %c0_27] : memref<4x64x1xf32, #tpu.memory_space<vmem>>, vector<1x64x1xf32>
    %40 = vector.shape_cast %39 : vector<1x64x1xf32> to vector<64x1xf32>
    %41 = vector.broadcast %40 : vector<64x1xf32> to vector<64x8xf32>
    %42 = arith.addf %38, %41 : vector<64x8xf32>
    %cst_28 = arith.constant 2.000000e-01 : f32
    %43 = vector.broadcast %cst_28 : f32 to vector<64x8xf32>
    %44 = arith.mulf %43, %42 : vector<64x8xf32>
    %45 = arith.maximumf %42, %44 : vector<64x8xf32>
    %c0_29 = arith.constant 0 : index
    %c0_30 = arith.constant 0 : index
    %46 = vector.load %arg4[%c0_29, %c0_30] : memref<64x1xf32, #tpu.memory_space<vmem>>, vector<64x1xf32>
    %47 = vector.broadcast %46 : vector<64x1xf32> to vector<64x8xf32>
    %48 = arith.mulf %45, %47 : vector<64x8xf32>
    %cst_31 = arith.constant dense<0.000000e+00> : vector<8xf32>
    %49 = vector.multi_reduction <add>, %48, %cst_31 [0] : vector<64x8xf32> to vector<8xf32>
    %50 = vector.shape_cast %49 : vector<8xf32> to vector<1x8xf32>
    %c0_32 = arith.constant 0 : index
    %c0_33 = arith.constant 0 : index
    %51 = vector.load %arg5[%c0_32, %c0_33] : memref<1x1xf32, #tpu.memory_space<vmem>>, vector<1x1xf32>
    %52 = vector.broadcast %51 : vector<1x1xf32> to vector<1x8xf32>
    %53 = arith.addf %50, %52 : vector<1x8xf32>
    %c0_34 = arith.constant 0 : index
    %c0_35 = arith.constant 0 : index
    %c0_36 = arith.constant 0 : index
    %54 = vector.load %arg6[%c0_34, %c0_35, %c0_36] : memref<1x1x8xf32, #tpu.memory_space<vmem>>, vector<1x1x8xf32>
    %55 = vector.shape_cast %54 : vector<1x1x8xf32> to vector<1x8xf32>
    %56 = vector.shape_cast %53 : vector<1x8xf32> to vector<1x1x8xf32>
    tpu.vector_store %arg6[%c0_34, %c0_35, %c0_36], %56 {strides = array<i32>} : memref<1x1x8xf32, #tpu.memory_space<vmem>>, vector<1x1x8xf32>,
    return
  }
  func.func @transform_0(%arg0: i32) -> (i32, i32) {
    %c0_i32 = arith.constant 0 : i32
    %c0_i32_0 = arith.constant 0 : i32
    return %arg0, %c0_i32 : i32, i32
  }
  func.func @transform_1(%arg0: i32) -> (i32, i32, i32) {
    %c0_i32 = arith.constant 0 : i32
    %c0_i32_0 = arith.constant 0 : i32
    %c0_i32_1 = arith.constant 0 : i32
    %c0_i32_2 = arith.constant 0 : i32
    return %c0_i32, %c0_i32_0, %c0_i32_1 : i32, i32, i32
  }
  func.func @transform_2(%arg0: i32) -> (i32, i32, i32) {
    %c0_i32 = arith.constant 0 : i32
    %c0_i32_0 = arith.constant 0 : i32
    %c0_i32_1 = arith.constant 0 : i32
    %c0_i32_2 = arith.constant 0 : i32
    return %c0_i32, %c0_i32_0, %c0_i32_1 : i32, i32, i32
  }
  func.func @transform_3(%arg0: i32) -> (i32, i32) {
    %c0_i32 = arith.constant 0 : i32
    %c0_i32_0 = arith.constant 0 : i32
    %c0_i32_1 = arith.constant 0 : i32
    return %c0_i32, %c0_i32_0 : i32, i32
  }
  func.func @transform_4(%arg0: i32) -> (i32, i32) {
    %c0_i32 = arith.constant 0 : i32
    %c0_i32_0 = arith.constant 0 : i32
    %c0_i32_1 = arith.constant 0 : i32
    return %c0_i32, %c0_i32_0 : i32, i32
  }
  func.func @transform_5(%arg0: i32) -> (i32, i32, i32) {
    %c0_i32 = arith.constant 0 : i32
    %c0_i32_0 = arith.constant 0 : i32
    %c0_i32_1 = arith.constant 0 : i32
    return %arg0, %c0_i32, %c0_i32_0 : i32, i32, i32
  }
}

</mosaic_0001>

<bundles_post_ra>
// kernel: tpu_custom_call.1
= control target key start
LH: loop header
LB: loop body
LE: loop exit
PB: predicated region body
PF: predicated region fallthrough
CT: control target
= control target key end

     0   :  { %s1285_s0 = inlined_call_operand.vmem [shape: f32[8,64], index: 0, kind: input, shape index: {}]   ;;  %s1286_s1 = inlined_call_operand.vmem [shape: bf16[4,64,64], index: 1, kind: input, shape index: {}]   ;;  %s1287_s2 = inlined_call_operand.vmem [shape: f32[4,64,1], index: 2, kind: input, shape index: {}]   ;;  %s1288_s3 = inlined_call_operand.vmem [shape: f32[64,1], index: 3, kind: input, shape index: {}]   ;;  %s1289_s4 = inlined_call_operand.<no memory space> [shape: f32[1,1], index: 4, kind: input, shape index: {}]   ;;  %s1290_s5 = inlined_call_operand.hbm [shape: f32[1,1,8], index: 5, kind: output, shape index: {}]  }
   0x1   :  { %v10_v0 = vstv %s1289_s4 }
   0x2   :  { %11 = vst [vmem:[#allocation2] sm:$0x1] %v10_v0 }
   0x3   :  { %v24_v1 = vld [vmem:[%s1285_s0] sm:$0xff]  ;;  %vm102_vm0 = vcmask 523264   ;;  %v1041_v4 = vmov 0   ;;  %v35_v7 = vld [vmem:[%s1287_s2 + $0x8] sm:$0xff]  ;;  %v36_v8 = vld [vmem:[%s1287_s2 + $0x10] sm:$0xff] }
   0x4   :  { %v25_v2 = vpack.c.bf16 %v24_v1, %v24_v1  ;;  %v1001_v3 = vld [vmem:[%s1286_s1] sm:$0xff]   ;;  %999 = vset.pattern.permute.xlu0 %v1041_v4  ;;  %1000 = vset.pattern.permute.xlu1 %v1041_v4  ;;  %v1002_v9 = vld [vmem:[%s1286_s1 + $0x8] sm:$0xff]   ;;  %v37_v10 = vld [vmem:[%s1287_s2 + $0x18] sm:$0xff] }
   0x5   :  { %v34_v5 = vld [vmem:[%s1287_s2] sm:$0xff]  ;;  %940 = vmatprep.mubr.msk.bf16.mxu0 %vm102_vm0, %v1001_v3  ;;  %54 = vperm.xlu1 %1000, %v36_v8   ;;  %v1003_v11 = vld [vmem:[%s1286_s1 + $0x10] sm:$0xff]   ;;  %v39_v13 = vld [vmem:[%s1287_s2 + $0x28] sm:$0xff] }
   0x6   :  { %996 = vmatprep.subr.msk.bf16.mxu0 %vm102_vm0, %v25_v2  ;;  %v116_v6 = vsel %vm102_vm0, %v25_v2, 0  ;;  %44 = vperm.xlu0 %999, %v34_v5   ;;  %v38_v12 = vld [vmem:[%s1287_s2 + $0x20] sm:$0xff]  ;;  %v40_v14 = vld [vmem:[%s1287_s2 + $0x30] sm:$0xff]  ;;  %v1004_v15 = vld [vmem:[%s1286_s1 + $0x18] sm:$0xff]  }
   0x7   :  { %939 = vmatpush3.bf16.xpose.msra.mxu0 %v116_v6  ;;  %v41_v16 = vld [vmem:[%s1287_s2 + $0x38] sm:$0xff]  ;;  %v845_v17 = vld [vmem:[%s1287_s2 + $0x40] sm:$0xff]  ;;  %v846_v18 = vld [vmem:[%s1287_s2 + $0x48] sm:$0xff] }
   0x8   :  { %v847_v19 = vld [vmem:[%s1287_s2 + $0x50] sm:$0xff]  ;;  %v848_v20 = vld [vmem:[%s1287_s2 + $0x58] sm:$0xff]  ;;  %v849_v21 = vld [vmem:[%s1287_s2 + $0x60] sm:$0xff] }
   0x9   :  { %59 = vperm.xlu1 %1000, %v37_v10  }
   0xa   :  { %49 = vperm.xlu0 %999, %v35_v7  }
   0xd   :  { %69 = vperm.xlu1 %1000, %v39_v13  }
   0xe   :  { %941 = vmatmul.mubr.msk.bf16.vlgmr.msra.gmra.mrb[0].mxu0 %vm102_vm0, %v1002_v9  ;;  %64 = vperm.xlu0 %999, %v38_v12  }
   0xf   :  { %944 = vmatprep.mubr.msk.bf16.mxu0 %vm102_vm0, %v1003_v11 }
  0x11   :  { %79 = vperm.xlu1 %1000, %v41_v16  }
  0x12   :  { %74 = vperm.xlu0 %999, %v40_v14  }
  0x15   :  { %228 = vperm.xlu1 %1000, %v846_v18  }
  0x16   :  { %945 = vmatmul.mubr.msk.bf16.gmra.mrb[4].mxu0 %vm102_vm0, %v1004_v15  ;;  %223 = vperm.xlu0 %999, %v845_v17  }
  0x19   :  { %238 = vperm.xlu1 %1000, %v848_v20  }
  0x1a   :  { %233 = vperm.xlu0 %999, %v847_v19  }
  0x1b   :  { %12 = vsyncpa [#allocation4], 0  ;;  %v850_v22 = vld [vmem:[%s1287_s2 + $0x68] sm:$0xff]  ;;  %v851_v23 = vld [vmem:[%s1287_s2 + $0x70] sm:$0xff]  ;;  %vm780_vm1 = vcmask 64512   ;;  %vm813_vm2 = vcmask 57344  }
  0x1c   :  { %v852_v24 = vld [vmem:[%s1287_s2 + $0x78] sm:$0xff]  ;;  %v869_v25 = vld [vmem:[%s1287_s2 + $0x80] sm:$0xff]  ;;  %v870_v26 = vld [vmem:[%s1287_s2 + $0x88] sm:$0xff] }
  0x1d   :  { %248 = vperm.xlu1 %1000, %v850_v22   ;;  %v871_v27 = vld [vmem:[%s1287_s2 + $0x90] sm:$0xff]  ;;  %v872_v28 = vld [vmem:[%s1287_s2 + $0x98] sm:$0xff]  ;;  %v873_v29 = vld [vmem:[%s1287_s2 + $0xa0] sm:$0xff] }
  0x1e   :  { %243 = vperm.xlu0 %999, %v849_v21   ;;  %v874_v30 = vld [vmem:[%s1287_s2 + $0xa8] sm:$0xff]  ;;  %v875_v31 = vld [vmem:[%s1287_s2 + $0xb0] sm:$0xff]  ;;  %v876_v32 = vld [vmem:[%s1287_s2 + $0xb8] sm:$0xff] }
  0x1f   :  { %v893_v33 = vld [vmem:[%s1287_s2 + $0xc0] sm:$0xff]  ;;  %v894_v34 = vld [vmem:[%s1287_s2 + $0xc8] sm:$0xff]  ;;  %v895_v35 = vld [vmem:[%s1287_s2 + $0xd0] sm:$0xff] }
  0x20   :  { %v896_v36 = vld [vmem:[%s1287_s2 + $0xd8] sm:$0xff]  ;;  %v897_v37 = vld [vmem:[%s1287_s2 + $0xe0] sm:$0xff]  ;;  %v725_v39 = vld [vmem:[%s1288_s3 + $0x8] sm:$0xff] }
  0x21   :  { %258 = vperm.xlu1 %1000, %v852_v24   ;;  %v724_v38 = vld [vmem:[%s1288_s3] sm:$0xff]  ;;  %v898_v40 = vld [vmem:[%s1287_s2 + $0xe8] sm:$0xff]  ;;  %v726_v41 = vld [vmem:[%s1288_s3 + $0x10] sm:$0xff] }
  0x22   :  { %253 = vperm.xlu0 %999, %v851_v23   ;;  %v899_v42 = vld [vmem:[%s1287_s2 + $0xf0] sm:$0xff]  ;;  %v727_v43 = vld [vmem:[%s1288_s3 + $0x18] sm:$0xff]  ;;  %v728_v45 = vld [vmem:[%s1288_s3 + $0x20] sm:$0xff] }
  0x23   :  { %v900_v44 = vld [vmem:[%s1287_s2 + $0xf8] sm:$0xff]  ;;  %v729_v46 = vld [vmem:[%s1288_s3 + $0x28] sm:$0xff]  ;;  %v730_v47 = vld [vmem:[%s1288_s3 + $0x30] sm:$0xff] }
  0x24   :  { %v731_v48 = vld [vmem:[%s1288_s3 + $0x38] sm:$0xff]  ;;  %v802_v49 = vld [vmem:[#allocation2] sm:$0x1] }
  0x25   :  { %403 = vperm.xlu1 %1000, %v870_v26   ;;  %v1005_v50 = vld [vmem:[%s1286_s1 + $0x20] sm:$0xff]  }
  0x26   :  { %398 = vperm.xlu0 %999, %v869_v25   ;;  %956 = vmatprep.mubr.msk.bf16.mxu1 %vm102_vm0, %v1005_v50 }
  0x29   :  { %413 = vperm.xlu1 %1000, %v872_v28  }
  0x2a   :  { %408 = vperm.xlu0 %999, %v871_v27  }
  0x2d   :  { %423 = vperm.xlu1 %1000, %v874_v30  }
  0x2e   :  { %418 = vperm.xlu0 %999, %v873_v29  }
  0x31   :  { %433 = vperm.xlu1 %1000, %v876_v32   ;;  %v1007_v32 = vld [vmem:[%s1286_s1 + $0x30] sm:$0xff]  }
  0x32   :  { %428 = vperm.xlu0 %999, %v875_v31   ;;  %v1006_v31 = vld [vmem:[%s1286_s1 + $0x28] sm:$0xff]  }
  0x35   :  { %578 = vperm.xlu1 %1000, %v894_v34   ;;  %v1009_v34 = vld [vmem:[%s1286_s1 + $0x40] sm:$0xff]  }
  0x36   :  { %573 = vperm.xlu0 %999, %v893_v33   ;;  %v1008_v33 = vld [vmem:[%s1286_s1 + $0x38] sm:$0xff]   ;;  %972 = vmatprep.mubr.msk.bf16.mxu0 %vm102_vm0, %v1009_v34 }
  0x39   :  { %588 = vperm.xlu1 %1000, %v896_v36  }
  0x3a   :  { %583 = vperm.xlu0 %999, %v895_v35  }
  0x3d   :  { %734 = vperm.xlu1 %1000, %v724_v38  }
  0x3e   :  { %593 = vperm.xlu0 %999, %v897_v37  }
  0x41   :  { %598 = vperm.xlu1 %1000, %v898_v40  }
  0x42   :  { %739 = vperm.xlu0 %999, %v725_v39  }
  0x45   :  { %603 = vperm.xlu1 %1000, %v899_v42  }
  0x46   :  { %744 = vperm.xlu0 %999, %v726_v41  }
  0x49   :  { %608 = vperm.xlu1 %1000, %v900_v44  }
  0x4a   :  { %749 = vperm.xlu0 %999, %v727_v43  }
  0x4d   :  { %759 = vperm.xlu1 %1000, %v729_v46  }
  0x4e   :  { %754 = vperm.xlu0 %999, %v728_v45  }
  0x51   :  { %769 = vperm.xlu1 %1000, %v731_v48  }
  0x52   :  { %764 = vperm.xlu0 %999, %v730_v47  }
  0x56   :  { %805 = vperm.xlu0 %999, %v802_v49  }
  0x84   :  { %v55_v52 = vpop.permute.xlu1 %54 }
  0x85   :  { %v45_v51 = vpop.permute.xlu0 %44 }
  0x88   :  { %v60_v54 = vpop.permute.xlu1 %59 }
  0x89   :  { %v50_v53 = vpop.permute.xlu0 %49 }
  0x8c   :  { %v70_v0 = vpop.permute.xlu1 %69 }
  0x8d   :  { %v65_v58 = vpop.permute.xlu0 %64 }
  0x90   :  { %v80_v14 = vpop.permute.xlu1 %79 }
  0x91   :  { %v75_v7 = vpop.permute.xlu0 %74 }
  0x94   :  { %v229_v36 = vpop.permute.xlu1 %228 }
  0x95   :  { %v224_v35 = vpop.permute.xlu0 %223 }
  0x98   :  { %v239_v38 = vpop.permute.xlu1 %238 }
  0x99   :  { %v234_v37 = vpop.permute.xlu0 %233 }
  0x9c   :  { %v249_v48 = vpop.permute.xlu1 %248 }
  0x9d   :  { %v244_v42 = vpop.permute.xlu0 %243 }
  0xe1   :  { %v942_v55 = vpop.f32.mrb[0].mxu0 }
  0xe2   :  { %v161_v56 = vadd.f32 %v942_v55, %v55_v52  ;;  %v152_v57 = vpop.f32.mrb[1].mxu0  ;;  %v254_v55 = vpop.permute.xlu0 %253 }
  0xe3   :  { %v153_v59 = vadd.f32 %v152_v57, %v45_v51  ;;  %v943_v60 = vpop.f32.mrb[2].mxu0 }
  0xe4   :  { %v185_v61 = vmul.f32 0.2, %v161_v56  ;;  %v164_v62 = vadd.f32 %v943_v60, %v60_v54  ;;  %v155_v63 = vpop.f32.mrb[3].mxu0 }
  0xe5   :  { %v183_v1 = vmul.f32 0.2, %v153_v59  ;;  %v156_v2 = vadd.f32 %v155_v63, %v50_v53 }
  0xe6   :  { %v186_v3 = vmul.f32 0.2, %v164_v62  ;;  %v193_v5 = vmax.f32 %v161_v56, %v185_v61 }
  0xe7   :  { %v184_v4 = vmul.f32 0.2, %v156_v2  ;;  %v191_v8 = vmax.f32 %v153_v59, %v183_v1 }
  0xe8   :  { %v194_v6 = vmax.f32 %v164_v62, %v186_v3  ;;  %v259_v62 = vpop.permute.xlu1 %258 }
  0xe9   :  { %v192_v9 = vmax.f32 %v156_v2, %v184_v4  ;;  %v946_v10 = vpop.f32.mrb[4].mxu0 }
  0xea   :  { %v177_v11 = vadd.f32 %v946_v10, %v75_v7  ;;  %v168_v12 = vpop.f32.mrb[5].mxu0  ;;  %v209_v13 = vpack.c.bf16 %v194_v6, %v193_v5 }
  0xeb   :  { %v169_v15 = vadd.f32 %v168_v12, %v65_v58  ;;  %v947_v16 = vpop.f32.mrb[6].mxu0  ;;  %v208_v17 = vpack.c.bf16 %v192_v9, %v191_v8 }
  0xec   :  { %v189_v18 = vmul.f32 0.2, %v177_v11  ;;  %v180_v19 = vadd.f32 %v947_v16, %v80_v14  ;;  %v171_v20 = vpop.f32.mrb[7].mxu0  ;;  %v1011_v16 = vld [vmem:[%s1286_s1 + $0x50] sm:$0xff]  }
  0xed   :  { %v187_v21 = vmul.f32 0.2, %v169_v15  ;;  %v172_v22 = vadd.f32 %v171_v20, %v70_v0  ;;  %948 = vmatprep.subr.bf16.mxu1 %v208_v17  ;;  %v404_v20 = vpop.permute.xlu1 %403 }
  0xee   :  { %v190_v23 = vmul.f32 0.2, %v180_v19  ;;  %949 = vmatpush3.bf16.msra.mxu1 %v208_v17  ;;  %v197_v25 = vmax.f32 %v177_v11, %v189_v18  ;;  %v1012_v17 = vld [vmem:[%s1286_s1 + $0x58] sm:$0xff]   ;;  %v1013_v18 = vld [vmem:[%s1286_s1 + $0x60] sm:$0xff]  }
  0xef   :  { %v188_v24 = vmul.f32 0.2, %v172_v22  ;;  %950 = vmatprep.subr.bf16.mxu1 %v209_v13  ;;  %v195_v27 = vmax.f32 %v169_v15, %v187_v21  ;;  %v1010_v15 = vld [vmem:[%s1286_s1 + $0x48] sm:$0xff]  }
  0xf0   :  { %v198_v26 = vmax.f32 %v180_v19, %v190_v23  ;;  %v399_v19 = vpop.permute.xlu0 %398 }
  0xf1   :  { %v196_v28 = vmax.f32 %v172_v22, %v188_v24  ;;  %v414_v22 = vpop.permute.xlu1 %413 }
  0xf2   :  { %951 = vmatpush3.bf16.msra.mxu1 %v209_v13  ;;  %v211_v29 = vpack.c.bf16 %v198_v26, %v197_v25 }
  0xf3   :  { %v210_v30 = vpack.c.bf16 %v196_v28, %v195_v27 }
  0xf4   :  { %v409_v21 = vpop.permute.xlu0 %408 }
  0xf5   :  { %952 = vmatprep.subr.bf16.mxu1 %v210_v30 }
  0xf6   :  { %953 = vmatpush3.bf16.msra.mxu1 %v210_v30 }
  0xf7   :  { %954 = vmatprep.subr.bf16.mxu1 %v211_v29 }
  0xf8   :  { %v419_v26 = vpop.permute.xlu0 %418 }
  0xfa   :  { %955 = vmatpush3.bf16.msra.mxu1 %v211_v29 }
  0xfd   :  { %957 = vmatmul.mubr.msk.bf16.vlgmr.msra.gmra.mrb[0].mxu1 %vm102_vm0, %v1006_v31 }
  0xfe   :  { %960 = vmatprep.mubr.msk.bf16.mxu1 %vm102_vm0, %v1007_v32  ;;  %v424_v32 = vpop.permute.xlu1 %423 }
 0x105   :  { %961 = vmatmul.mubr.msk.bf16.gmra.mrb[4].mxu1 %vm102_vm0, %v1008_v33 }
 0x106   :  { %988 = vmatprep.mubr.msk.bf16.mxu1 %vm102_vm0, %v1013_v18 }
 0x1d0   :  { %v958_v39 = vpop.f32.mrb[0].mxu1 }
 0x1d1   :  { %v336_v40 = vadd.f32 %v958_v39, %v234_v37  ;;  %v327_v41 = vpop.f32.mrb[1].mxu1  ;;  %v429_v39 = vpop.permute.xlu0 %428 }
 0x1d2   :  { %v328_v43 = vadd.f32 %v327_v41, %v224_v35  ;;  %v959_v44 = vpop.f32.mrb[2].mxu1 }
 0x1d3   :  { %v360_v45 = vmul.f32 0.2, %v336_v40  ;;  %v339_v46 = vadd.f32 %v959_v44, %v239_v38  ;;  %v330_v47 = vpop.f32.mrb[3].mxu1 }
 0x1d4   :  { %v358_v49 = vmul.f32 0.2, %v328_v43  ;;  %v331_v50 = vadd.f32 %v330_v47, %v229_v36 }
 0x1d5   :  { %v361_v51 = vmul.f32 0.2, %v339_v46  ;;  %v368_v53 = vmax.f32 %v336_v40, %v360_v45 }
 0x1d6   :  { %v359_v52 = vmul.f32 0.2, %v331_v50  ;;  %v366_v56 = vmax.f32 %v328_v43, %v358_v49 }
 0x1d7   :  { %v369_v54 = vmax.f32 %v339_v46, %v361_v51  ;;  %v434_v46 = vpop.permute.xlu1 %433 }
 0x1d8   :  { %v367_v57 = vmax.f32 %v331_v50, %v359_v52  ;;  %v962_v58 = vpop.f32.mrb[4].mxu1 }
 0x1d9   :  { %v352_v59 = vadd.f32 %v962_v58, %v254_v55  ;;  %v343_v60 = vpop.f32.mrb[5].mxu1  ;;  %v384_v61 = vpack.c.bf16 %v369_v54, %v368_v53 }
 0x1da   :  { %v344_v63 = vadd.f32 %v343_v60, %v244_v42  ;;  %v963_v0 = vpop.f32.mrb[6].mxu1  ;;  %v383_v1 = vpack.c.bf16 %v367_v57, %v366_v56 }
 0x1db   :  { %v364_v2 = vmul.f32 0.2, %v352_v59  ;;  %v355_v3 = vadd.f32 %v963_v0, %v259_v62  ;;  %v346_v4 = vpop.f32.mrb[7].mxu1  ;;  %v1015_v0 = vld [vmem:[%s1286_s1 + $0x70] sm:$0xff]  }
 0x1dc   :  { %v362_v5 = vmul.f32 0.2, %v344_v63  ;;  %v347_v6 = vadd.f32 %v346_v4, %v249_v48  ;;  %964 = vmatprep.subr.bf16.mxu0 %v383_v1 }
 0x1dd   :  { %v365_v7 = vmul.f32 0.2, %v355_v3  ;;  %965 = vmatpush3.bf16.msra.mxu0 %v383_v1  ;;  %v372_v9 = vmax.f32 %v352_v59, %v364_v2  ;;  %v1016_v1 = vld [vmem:[%s1286_s1 + $0x78] sm:$0xff]   ;;  %v574_v2 = vpop.permute.xlu0 %573 }
 0x1de   :  { %v363_v8 = vmul.f32 0.2, %v347_v6  ;;  %966 = vmatprep.subr.bf16.mxu0 %v384_v61  ;;  %v370_v11 = vmax.f32 %v344_v63, %v362_v5  ;;  %v1014_v63 = vld [vmem:[%s1286_s1 + $0x68] sm:$0xff]   ;;  %s1042_s1 = smov [#allocation3]  }
 0x1df   :  { %v373_v10 = vmax.f32 %v355_v3, %v365_v7  ;;  %v579_v3 = vpop.permute.xlu1 %578  ;;  %s821_s24 = sshll.u32 %s1042_s1, 4  ;;  %s822_s24 = int_to_ptr.vmem [resolvable:$true] %s821_s24 }
 0x1e0   :  { %v371_v12 = vmax.f32 %v347_v6, %v363_v8  ;;  %s1017_s25 = scalar_lea.vmem %s822_s24, 16  ;;  %s1021_s0 = scalar_lea.vmem %s822_s24, 32 }
 0x1e1   :  { %967 = vmatpush3.bf16.msra.mxu0 %v384_v61  ;;  %v386_v13 = vpack.c.bf16 %v373_v10, %v372_v9  ;;  %v584_v4 = vpop.permute.xlu0 %583  ;;  %p1018_p0 = scmp.ne.s32.totalorder %s822_s24, %s1017_s25  ;;  %p1022_p1 = scmp.lt.s32.totalorder %s822_s24, %s822_s24 }
 0x1e2   :  { %v385_v14 = vpack.c.bf16 %v371_v12, %v370_v11  ;;  %p1023_p2 = scmp.lt.s32.totalorder %s1021_s0, %s1017_s25 }
 0x1e3   :  { %v589_v5 = vpop.permute.xlu1 %588 }
 0x1e4   :  { %968 = vmatprep.subr.bf16.mxu0 %v385_v14  ;;  %p1024_p3 = por %p1023_p2, %p1022_p1 }
 0x1e5   :  { %969 = vmatpush3.bf16.msra.mxu0 %v385_v14  ;;  %v594_v6 = vpop.permute.xlu0 %593 }
 0x1e6   :  { %970 = vmatprep.subr.bf16.mxu0 %v386_v13  ;;  %p1025_p4 = pnand %p1024_p3, %p1018_p0 }
 0x1e7   :  { %v735_v7 = vpop.permute.xlu1 %734 }
 0x1e9   :  { %971 = vmatpush3.bf16.msra.mxu0 %v386_v13  ;;  %v740_v8 = vpop.permute.xlu0 %739 }
 0x1eb   :  { %v599_v9 = vpop.permute.xlu1 %598 }
 0x1ec   :  { %973 = vmatmul.mubr.msk.bf16.vlgmr.msra.gmra.mrb[8].mxu0 %vm102_vm0, %v1010_v15 }
 0x1ed   :  { %976 = vmatprep.mubr.msk.bf16.mxu0 %vm102_vm0, %v1011_v16  ;;  %v745_v10 = vpop.permute.xlu0 %744 }
 0x1ef   :  { %v604_v12 = vpop.permute.xlu1 %603 }
 0x1f4   :  { %977 = vmatmul.mubr.msk.bf16.gmra.mrb[12].mxu0 %vm102_vm0, %v1012_v17 }
 0x2bf   :  { %v974_v23 = vpop.f32.mrb[8].mxu0 }
 0x2c0   :  { %v511_v24 = vadd.f32 %v974_v23, %v409_v21  ;;  %v502_v25 = vpop.f32.mrb[9].mxu0 }
 0x2c1   :  { %v503_v27 = vadd.f32 %v502_v25, %v399_v19  ;;  %v975_v28 = vpop.f32.mrb[10].mxu0 }
 0x2c2   :  { %v535_v29 = vmul.f32 0.2, %v511_v24  ;;  %v514_v30 = vadd.f32 %v975_v28, %v414_v22  ;;  %v505_v31 = vpop.f32.mrb[11].mxu0  ;;  %v750_v22 = vpop.permute.xlu0 %749 }
 0x2c3   :  { %v533_v33 = vmul.f32 0.2, %v503_v27  ;;  %v506_v34 = vadd.f32 %v505_v31, %v404_v20 }
 0x2c4   :  { %v536_v35 = vmul.f32 0.2, %v514_v30  ;;  %v543_v37 = vmax.f32 %v511_v24, %v535_v29 }
 0x2c5   :  { %v534_v36 = vmul.f32 0.2, %v506_v34  ;;  %v541_v40 = vmax.f32 %v503_v27, %v533_v33  ;;  %v609_v27 = vpop.permute.xlu1 %608 }
 0x2c6   :  { %v544_v38 = vmax.f32 %v514_v30, %v536_v35 }
 0x2c7   :  { %v542_v41 = vmax.f32 %v506_v34, %v534_v36  ;;  %v978_v42 = vpop.f32.mrb[12].mxu0 }
 0x2c8   :  { %v527_v43 = vadd.f32 %v978_v42, %v429_v39  ;;  %v518_v44 = vpop.f32.mrb[13].mxu0  ;;  %v559_v45 = vpack.c.bf16 %v544_v38, %v543_v37  ;;  %v755_v38 = vpop.permute.xlu0 %754 }
 0x2c9   :  { %v519_v47 = vadd.f32 %v518_v44, %v419_v26  ;;  %v979_v48 = vpop.f32.mrb[14].mxu0  ;;  %v558_v49 = vpack.c.bf16 %v542_v41, %v541_v40 }
 0x2ca   :  { %v539_v50 = vmul.f32 0.2, %v527_v43  ;;  %v530_v51 = vadd.f32 %v979_v48, %v434_v46  ;;  %v521_v52 = vpop.f32.mrb[15].mxu0 }
 0x2cb   :  { %v537_v53 = vmul.f32 0.2, %v519_v47  ;;  %v522_v54 = vadd.f32 %v521_v52, %v424_v32  ;;  %980 = vmatprep.subr.bf16.mxu1 %v558_v49 }
 0x2cc   :  { %v540_v55 = vmul.f32 0.2, %v530_v51  ;;  %981 = vmatpush3.bf16.msra.mxu1 %v558_v49  ;;  %v547_v57 = vmax.f32 %v527_v43, %v539_v50 }
 0x2cd   :  { %v538_v56 = vmul.f32 0.2, %v522_v54  ;;  %982 = vmatprep.subr.bf16.mxu1 %v559_v45  ;;  %v545_v59 = vmax.f32 %v519_v47, %v537_v53  ;;  %v760_v47 = vpop.permute.xlu1 %759 }
 0x2ce   :  { %v548_v58 = vmax.f32 %v530_v51, %v540_v55 }
 0x2cf   :  { %v546_v60 = vmax.f32 %v522_v54, %v538_v56 }
 0x2d0   :  { %983 = vmatpush3.bf16.msra.mxu1 %v559_v45  ;;  %v561_v61 = vpack.c.bf16 %v548_v58, %v547_v57 }
 0x2d1   :  { %v560_v62 = vpack.c.bf16 %v546_v60, %v545_v59  ;;  %v765_v59 = vpop.permute.xlu0 %764 }
 0x2d3   :  { %984 = vmatprep.subr.bf16.mxu1 %v560_v62 }
 0x2d4   :  { %985 = vmatpush3.bf16.msra.mxu1 %v560_v62 }
 0x2d5   :  { %986 = vmatprep.subr.bf16.mxu1 %v561_v61 }
 0x2d8   :  { %987 = vmatpush3.bf16.msra.mxu1 %v561_v61 }
 0x2db   :  { %989 = vmatmul.mubr.msk.bf16.vlgmr.msra.gmra.mrb[8].mxu1 %vm102_vm0, %v1014_v63 }
 0x2dc   :  { %992 = vmatprep.mubr.msk.bf16.mxu1 %vm102_vm0, %v1015_v0  ;;  %v770_v0 = vpop.permute.xlu1 %769 }
 0x2e3   :  { %993 = vmatmul.mubr.msk.bf16.gmra.mrb[12].mxu1 %vm102_vm0, %v1016_v1 }
 0x3ae   :  { %v990_v11 = vpop.f32.mrb[8].mxu1 }
 0x3af   :  { %v686_v13 = vadd.f32 %v990_v11, %v584_v4  ;;  %v677_v14 = vpop.f32.mrb[9].mxu1 }
 0x3b0   :  { %v678_v15 = vadd.f32 %v677_v14, %v574_v2  ;;  %v991_v16 = vpop.f32.mrb[10].mxu1 }
 0x3b1   :  { %v710_v17 = vmul.f32 0.2, %v686_v13  ;;  %v689_v18 = vadd.f32 %v991_v16, %v589_v5  ;;  %v680_v19 = vpop.f32.mrb[11].mxu1  ;;  %v806_v16 = vpop.permute.xlu0 %805 }
 0x3b2   :  { %v708_v20 = vmul.f32 0.2, %v678_v15  ;;  %v681_v21 = vadd.f32 %v680_v19, %v579_v3 }
 0x3b3   :  { %v711_v23 = vmul.f32 0.2, %v689_v18  ;;  %v718_v24 = vmax.f32 %v686_v13, %v710_v17 }
 0x3b4   :  { %v716_v25 = vmax.f32 %v678_v15, %v708_v20  ;;  %v709_v26 = vmul.f32 0.2, %v681_v21 }
 0x3b5   :  { %v719_v28 = vmax.f32 %v689_v18, %v711_v23  ;;  %v774_v34 = vmul.f32 %v745_v10, %v718_v24 }
 0x3b6   :  { %v772_v29 = vmul.f32 %v735_v7, %v716_v25  ;;  %v717_v30 = vmax.f32 %v681_v21, %v709_v26  ;;  %v994_v31 = vpop.f32.mrb[12].mxu1 }
 0x3b7   :  { %v702_v32 = vadd.f32 %v994_v31, %v604_v12  ;;  %v693_v33 = vpop.f32.mrb[13].mxu1  ;;  %v775_v39 = vmul.f32 %v750_v22, %v719_v28  ;;  %v784_v50 = vsel %vm780_vm1, %v774_v34, 0.0 }
 0x3b8   :  { %v773_v35 = vmul.f32 %v740_v8, %v717_v30  ;;  %v694_v36 = vadd.f32 %v693_v33, %v594_v6  ;;  %v995_v37 = vpop.f32.mrb[14].mxu1  ;;  %v781_v43 = vsel %vm780_vm1, %v772_v29, 0.0  ;;  %v808_v8 = vlaneseq }
 0x3b9   :  { %v714_v40 = vmul.f32 0.2, %v702_v32  ;;  %v705_v41 = vadd.f32 %v995_v37, %v609_v27  ;;  %v696_v42 = vpop.f32.mrb[15].mxu1  ;;  %v786_v55 = vsel %vm780_vm1, %v775_v39, 0.0 }
 0x3ba   :  { %v782_v44 = vsel %vm780_vm1, %v773_v35, 0.0  ;;  %v712_v45 = vmul.f32 0.2, %v694_v36  ;;  %v697_v46 = vadd.f32 %v696_v42, %v599_v9  ;;  %v809_v11 = vshrl.u32 %v808_v8, 7 }
 0x3bb   :  { %v783_v48 = vadd.f32 %v782_v44, %v781_v43  ;;  %v715_v49 = vmul.f32 0.2, %v705_v41  ;;  %v722_v51 = vmax.f32 %v702_v32, %v714_v40 }
 0x3bc   :  { %v720_v52 = vmax.f32 %v694_v36, %v712_v45  ;;  %v713_v53 = vmul.f32 0.2, %v697_v46  ;;  %v810_v14 = vsub.s32 0, %v809_v11 }
 0x3bd   :  { %v785_v54 = vadd.f32 %v784_v50, %v783_v48  ;;  %v723_v57 = vmax.f32 %v705_v41, %v715_v49  ;;  %v778_v61 = vmul.f32 %v765_v59, %v722_v51 }
 0x3be   :  { %v776_v56 = vmul.f32 %v755_v38, %v720_v52  ;;  %v721_v58 = vmax.f32 %v697_v46, %v713_v53  ;;  %v811_v18 = vrot.slane %v806_v16, %v810_v14 }
 0x3bf   :  { %v787_v60 = vadd.f32 %v786_v55, %v785_v54  ;;  %v779_v2 = vmul.f32 %v770_v0, %v723_v57  ;;  %v792_v5 = vsel %vm780_vm1, %v778_v61, 0.0 }
 0x3c0   :  { %v788_v62 = vsel %vm780_vm1, %v776_v56, 0.0  ;;  %v777_v63 = vmul.f32 %v760_v47, %v721_v58 }
 0x3c1   :  { %v789_v1 = vadd.f32 %v788_v62, %v787_v60  ;;  %v794_v7 = vsel %vm780_vm1, %v779_v2, 0.0 }
 0x3c2   :  { %v790_v3 = vsel %vm780_vm1, %v777_v63, 0.0 }
 0x3c3   :  { %v791_v4 = vadd.f32 %v790_v3, %v789_v1 }
 0x3c5   :  { %v793_v6 = vadd.f32 %v792_v5, %v791_v4 }
 0x3c7   :  { %v795_v9 = vadd.f32 %v794_v7, %v793_v6 }
 0x3c9   :  { %v796_v10 = vrot.slane %v795_v9, 4 }
 0x3cb   :  { %v797_v12 = vadd.f32 %v796_v10, %v795_v9 }
 0x3cd   :  { %v798_v13 = vrot.slane %v797_v12, 2 }
 0x3cf   :  { %v799_v15 = vadd.f32 %v798_v13, %v797_v12 }
 0x3d1   :  { %v800_v17 = vrot.slane %v799_v15, 1 }
 0x3d3   :  { %v801_v19 = vadd.f32 %v800_v17, %v799_v15 }
 0x3d5   :  { %v812_v20 = vadd.f32 %v811_v18, %v801_v19 }
 0x3d7   :  { %814 = vst.msk [vmem:[#allocation3] sm:$0x1] %vm813_vm2, %v812_v20 }
 0x3d8   :  { %1028 = shalt.err (!%p1025_p4)
}
 0x3d9   :  { %s1029_s2 = scalar_lea.hbm %s1290_s5, 16 }
 0x3da   :  { %p1030_p5 = scmp.ne.s32.totalorder %s1290_s5, %s1029_s2  ;;  %p1033_p6 = scmp.lt.u32.totalorder %s1029_s2, %s1290_s5 }
 0x3dc   :  { %p1035_p7 = pnand %p1033_p6, %p1030_p5 }
 0x3de   :  { %1038 = shalt.err (!%p1035_p7)
}
 0x3df   :  { %824 = dma.vmem_to_hbm [thread:$0]  %s822_s24, 16, %s1290_s5, [#allocation4]  }
 0x3e0   :  { %1039 = dma.done.wait [#allocation4], 16  }
 0x3e1   :  { %1040 = vsyncadd [#allocation4], 4294967280 }
 0x3e2   :  { %828 = vsyncpa [#allocation4], 1 }

</bundles_post_ra>
